<compile_context>
chip_gen: v6e
topology: v6e:2x2x1
jax: 0.10.0
libtpu: 0.0.40
codegen_flags: <defaults>
</compile_context>

<pallas_src>
import math
import functools

import jax
import jax.numpy as jnp
from jax.experimental import pallas as pl
from jax.experimental.pallas import tpu as pltpu

# ---------------- configuration (small synthetic shapes) ----------------
B = 2             # batch
N_RES = 8         # residues (power of two -> cheap block-diag mask in kernel)
MSA_CH = 32       # msa_channel
PAIR_CH = 16      # pair_channel
NUM_HEAD = 4
NUM_SCALAR_QK = 8
NUM_POINT_QK = 4
NUM_SCALAR_V = 8
NUM_POINT_V = 4
NUM_CHANNEL = 32  # num_output

FP16_HUGE = 65504.0     # torch FP16_huge (finfo(float16).max)
DIST_EPSILON = 1e-8
ZERO_INIT = False       # global_config.zero_init=False so output is non-trivial


# ---------------- Pallas kernel ----------------
def _ipa_attention_kernel(qa_ref, ka_ref, va_ref, bias_ref, p2d_ref, out_ref):
    # One batch element per grid step (leading block dim is 1).
    qa = qa_ref[0]                          # (H, N, Fqk) bf16  [q | qp | -0.5|qp|^2 | 1]
    ka = ka_ref[0]                          # (H, N, Fqk) bf16  [k | kp | 1 | -0.5|kp|^2]
    bias = bias_ref[0]                      # (H, N, N)   f32   pair bias + mask bias

    # All three logit terms from ONE batched MXU matmul (f32 accumulation):
    #   q.k  +  qp.kp - 0.5|qp|^2 - 0.5|kp|^2   (scalar + point logits)
    logits = jnp.einsum('hif,hjf->hij', qa, ka,
                        preferred_element_type=jnp.float32) + bias

    # softmax over keys in f32; divide goes to the EUP via approx reciprocal.
    m = jnp.max(logits, axis=-1, keepdims=True)
    e = jnp.exp(logits - m)
    attn = e * pl.reciprocal(jnp.sum(e, axis=-1, keepdims=True), approx=True)

    h, n, _ = attn.shape                    # static Python ints
    attn_b = attn.astype(jnp.bfloat16)

    # attn @ [V_scalar | V_point(xyz)]: one batched bf16 MXU matmul.
    out_sv = jnp.einsum('hij,hjf->hif', attn_b, va_ref[0],
                        preferred_element_type=jnp.float32)      # (H, N, Fv) f32

    # Attention over pair activations: out[h,i,c] = sum_j attn[h,i,j]*p2d[i,j,c].
    # The batch dim of this contraction is the query index i, which is not a
    # leading dim of attn; instead of an in-kernel transpose we express it as a
    # single plain 2-D MXU matmul with a block-diagonal-masked lhs:
    #   A[(h,i),(i',j)] = attn[h,i,j] * (i == i'),   P[(i',j),c] = p2d[i',j,c]
    #   => (A @ P)[(h,i),c] = sum_j attn[h,i,j] * p2d[i,j,c]
    attn_flat = attn.reshape(h * n, n)                  # rows enumerate (h, i)
    row = jax.lax.broadcasted_iota(jnp.int32, (h * n, n * n), 0)
    col = jax.lax.broadcasted_iota(jnp.int32, (h * n, n * n), 1)
    log2n = n.bit_length() - 1                          # n is a power of two
    blk_mask = (row & (n - 1)) == (col >> log2n)        # i == i'
    tiled = jnp.tile(attn_flat, (1, n))                 # value at col = attn[., col % n]
    a_blockdiag = jnp.where(blk_mask, tiled,
                            jnp.zeros_like(tiled)).astype(jnp.bfloat16)  # (H*N, N*N)
    out_2d = jnp.dot(a_blockdiag, p2d_ref[0],
                     preferred_element_type=jnp.float32)                 # (H*N, C2) f32

    # Single whole-tile store: [attn@V | attn@pair] laid out as (H*N, Fv+C2).
    out_ref[0] = jnp.concatenate([out_sv.reshape(h * n, -1), out_2d], axis=-1)


def ipa_attention_pallas(q_aug, k_aug, v_all, bias, in2d_flat):
    b, h, n, fqk = q_aug.shape
    fv = v_all.shape[-1]
    c2 = in2d_flat.shape[-1]
    assert n > 0 and (n & (n - 1)) == 0, "kernel block-diag mask assumes power-of-two N"

    def spec4(shape):
        return pl.BlockSpec((1,) + shape, lambda bb: (bb, 0, 0, 0))

    def spec3(shape):
        return pl.BlockSpec((1,) + shape, lambda bb: (bb, 0, 0))

    out = pl.pallas_call(
        _ipa_attention_kernel,
        out_shape=jax.ShapeDtypeStruct((b, h * n, fv + c2), jnp.float32),
        grid=(b,),
        in_specs=[spec4((h, n, fqk)),      # q_aug (bf16)
                  spec4((h, n, fqk)),      # k_aug (bf16)
                  spec4((h, n, fv)),       # v_all (bf16)
                  spec4((h, n, n)),        # bias (f32)
                  spec3((n * n, c2))],     # pair activations, flattened, bf16
        out_specs=spec3((h * n, fv + c2)),
        compiler_params=pltpu.CompilerParams(
            dimension_semantics=("parallel",)),  # megacore on v7x; no-op on v5e/v6e
    )(q_aug, k_aug, v_all, bias, in2d_flat)

    out = out.reshape(b, h, n, fv + c2)
    return out[..., :fv], out[..., fv:]      # (B,H,N,Fv), (B,H,N,C2)


# ---------------- pure-JAX f32 reference for the attention core ----------------
def ipa_attention_reference(q, k, qp_s, kp_s, v_all, bias, inputs_2d):
    attn_qk_scalar = jnp.einsum('bhik,bhjk->bhij', q, k)
    d = qp_s[:, :, :, None, :] - kp_s[:, :, None, :, :]
    attn_qk_point = -0.5 * jnp.sum(d * d, axis=-1)
    attn = jax.nn.softmax(attn_qk_scalar + attn_qk_point + bias, axis=-1)
    out_sv = jnp.einsum('bhij,bhjf->bhif', attn, v_all)
    out_2d = jnp.einsum('bhij,bijc->bhic', attn, inputs_2d)
    return out_sv, out_2d


# ---------------- affine (rigid frame) helpers — glue ----------------
def affine_apply_to_point(rot, trans, points):
    px, py, pz = points
    r = lambda i, j: rot[..., i, j][..., None]
    t = lambda i: trans[..., i][..., None]
    gx = r(0, 0) * px + r(0, 1) * py + r(0, 2) * pz + t(0)
    gy = r(1, 0) * px + r(1, 1) * py + r(1, 2) * pz + t(1)
    gz = r(2, 0) * px + r(2, 1) * py + r(2, 2) * pz + t(2)
    return [gx, gy, gz]


def affine_invert_point(rot, trans, points):
    gx, gy, gz = points
    r = lambda i, j: rot[..., i, j][..., None]
    t = lambda i: trans[..., i][..., None]
    dx, dy, dz = gx - t(0), gy - t(1), gz - t(2)
    lx = r(0, 0) * dx + r(1, 0) * dy + r(2, 0) * dz
    ly = r(0, 1) * dx + r(1, 1) * dy + r(2, 1) * dz
    lz = r(0, 2) * dx + r(1, 2) * dy + r(2, 2) * dz
    return [lx, ly, lz]


def quat_to_rot(quat):
    q = quat / jnp.linalg.norm(quat, axis=-1, keepdims=True)
    w, x, y, z = q[..., 0], q[..., 1], q[..., 2], q[..., 3]
    rot = jnp.stack([
        jnp.stack([1 - 2 * (y * y + z * z), 2 * (x * y - w * z), 2 * (x * z + w * y)], -1),
        jnp.stack([2 * (x * y + w * z), 1 - 2 * (x * x + z * z), 2 * (y * z - w * x)], -1),
        jnp.stack([2 * (x * z - w * y), 2 * (y * z + w * x), 1 - 2 * (x * x + y * y)], -1),
    ], -2)
    return rot


# ---------------- full forward ----------------
def ipa_forward(params, inputs_1d, inputs_2d, mask, rot, trans, *, use_pallas):
    b, n, _ = inputs_1d.shape
    h, sqk, pqk = NUM_HEAD, NUM_SCALAR_QK, NUM_POINT_QK
    sv, pv = NUM_SCALAR_V, NUM_POINT_V
    c2 = inputs_2d.shape[-1]

    def linear(x, p):
        w, bias_ = p
        return x @ w + bias_

    q_scalar = linear(inputs_1d, params['q_scalar']).reshape(b, n, h, sqk)
    kv_scalar = linear(inputs_1d, params['kv_scalar']).reshape(b, n, h, sv + sqk)
    k_scalar = kv_scalar[..., :sqk]
    v_scalar = kv_scalar[..., sqk:]

    q_point_local = jnp.split(linear(inputs_1d, params['q_point_local']), 3, axis=-1)
    q_point_global = affine_apply_to_point(rot, trans, q_point_local)
    q_point = [x.reshape(b, n, h, pqk) for x in q_point_global]

    kv_point_local = jnp.split(linear(inputs_1d, params['kv_point_local']), 3, axis=-1)
    kv_point_global = affine_apply_to_point(rot, trans, kv_point_local)
    kv_point_global = [x.reshape(b, n, h, pqk + pv) for x in kv_point_global]
    k_point = [x[..., :pqk] for x in kv_point_global]
    v_point = [x[..., pqk:] for x in kv_point_global]

    scalar_variance = max(sqk, 1) * 1.0
    point_variance = max(pqk, 1) * 9.0 / 2
    num_logit_terms = 3
    scalar_weights = math.sqrt(1.0 / (num_logit_terms * scalar_variance))
    point_weights = math.sqrt(1.0 / (num_logit_terms * point_variance))
    attention_2d_weights = math.sqrt(1.0 / num_logit_terms)
    point_weights = point_weights * jax.nn.softplus(params['trainable_point_weights'])  # (H,)

    sw = lambda x: jnp.swapaxes(x, -2, -3)                  # (B,N,H,X) -> (B,H,N,X)
    q = sw(scalar_weights * q_scalar)                        # (B,H,N,Sqk)
    k = sw(k_scalar)
    qp = jnp.concatenate([sw(x) for x in q_point], axis=-1)  # (B,H,N,3*Pqk)
    kp = jnp.concatenate([sw(x) for x in k_point], axis=-1)
    sqrt_pw = jnp.sqrt(point_weights)[None, :, None, None]
    qp_s = qp * sqrt_pw
    kp_s = kp * sqrt_pw
    # [V_scalar | V_point(xyz)] pre-concatenated so the kernel does one attn@V matmul.
    v_all = jnp.concatenate([sw(v_scalar)] + [sw(x) for x in v_point], axis=-1)

    attn_2d = linear(inputs_2d, params['attention_2d'])      # (B,N,N,H)
    attn_2d = jnp.transpose(attn_2d, (0, 3, 1, 2)) * attention_2d_weights
    mask_2d = mask * jnp.swapaxes(mask, -1, -2)               # (B,N,N)
    bias = attn_2d - FP16_HUGE * (1.0 - mask_2d)[:, None, :, :]

    if use_pallas:
        # Augment q/k with point-norm columns so a single matmul yields
        # q.k + qp.kp - 0.5|qp|^2 - 0.5|kp|^2 (== scalar + point logits).
        q_nrm = -0.5 * jnp.sum(qp_s * qp_s, axis=-1, keepdims=True)
        k_nrm = -0.5 * jnp.sum(kp_s * kp_s, axis=-1, keepdims=True)
        ones = jnp.ones_like(q_nrm)
        q_aug = jnp.concatenate([q, qp_s, q_nrm, ones], axis=-1).astype(jnp.bfloat16)
        k_aug = jnp.concatenate([k, kp_s, ones, k_nrm], axis=-1).astype(jnp.bfloat16)
        in2d_flat = inputs_2d.reshape(b, n * n, c2).astype(jnp.bfloat16)
        out_sv, out_2d = ipa_attention_pallas(
            q_aug, k_aug, v_all.astype(jnp.bfloat16), bias, in2d_flat)
    else:
        out_sv, out_2d = ipa_attention_reference(q, k, qp_s, kp_s, v_all, bias, inputs_2d)

    out_s = out_sv[..., :sv]               # (B,H,N,Sv)
    out_p = out_sv[..., sv:]               # (B,H,N,3*Pv)

    result_scalar = jnp.swapaxes(out_s, 1, 2).reshape(b, n, h * sv)
    rpg = [jnp.swapaxes(x, 1, 2).reshape(b, n, h * pv)
           for x in jnp.split(out_p, 3, axis=-1)]
    rpl = affine_invert_point(rot, trans, rpg)
    dist_feat = jnp.sqrt(DIST_EPSILON + rpl[0] ** 2 + rpl[1] ** 2 + rpl[2] ** 2)
    result_2d = jnp.swapaxes(out_2d, 1, 2).reshape(b, n, h * c2)

    final_act = jnp.concatenate(
        [result_scalar, rpl[0], rpl[1], rpl[2], dist_feat, result_2d], axis=-1)

    # Output projection: a (B*N)x160x32 matmul is far below kernel-launch cost,
    # so it is intentionally left to XLA instead of a dedicated kernel.
    w_out, b_out = params['output_projection']
    return final_act @ w_out + b_out


# ---------------- deterministic parameter init ----------------
def linear_params(key, fan_in, fan_out, scale=0.1):
    kw, kb = jax.random.split(key)
    w = jax.random.normal(kw, (fan_in, fan_out), jnp.float32) * scale
    bias_ = jax.random.normal(kb, (fan_out,), jnp.float32) * scale
    return w, bias_


if __name__ == "__main__":
    key = jax.random.PRNGKey(0)
    ks = jax.random.split(key, 12)

    num_final_input = (NUM_HEAD * NUM_SCALAR_V
                       + NUM_HEAD * NUM_POINT_V * 4
                       + NUM_HEAD * PAIR_CH)

    out_proj = linear_params(ks[5], num_final_input, NUM_CHANNEL)
    if ZERO_INIT:
        out_proj = (jnp.zeros_like(out_proj[0]), out_proj[1])

    params = {
        'q_scalar': linear_params(ks[0], MSA_CH, NUM_HEAD * NUM_SCALAR_QK),
        'kv_scalar': linear_params(ks[1], MSA_CH, NUM_HEAD * (NUM_SCALAR_V + NUM_SCALAR_QK)),
        'q_point_local': linear_params(ks[2], MSA_CH, NUM_HEAD * 3 * NUM_POINT_QK),
        'kv_point_local': linear_params(ks[3], MSA_CH, NUM_HEAD * 3 * (NUM_POINT_QK + NUM_POINT_V)),
        'attention_2d': linear_params(ks[4], PAIR_CH, NUM_HEAD),
        'trainable_point_weights': jnp.ones((NUM_HEAD,), jnp.float32) * 0.541323855,
        'output_projection': out_proj,
    }

    inputs_1d = jax.random.normal(ks[6], (B, N_RES, MSA_CH), jnp.float32)
    inputs_2d = jax.random.normal(ks[7], (B, N_RES, N_RES, PAIR_CH), jnp.float32)
    mask = (jax.random.uniform(ks[8], (B, N_RES, 1)) > 0.1).astype(jnp.float32)
    rot = quat_to_rot(jax.random.normal(ks[9], (B, N_RES, 4), jnp.float32))
    trans = jax.random.normal(ks[10], (B, N_RES, 3), jnp.float32)

    forward_pallas = jax.jit(functools.partial(ipa_forward, use_pallas=True))
    forward_ref = jax.jit(functools.partial(ipa_forward, use_pallas=False))

    out_pallas = jax.block_until_ready(
        forward_pallas(params, inputs_1d, inputs_2d, mask, rot, trans))
    out_ref = jax.block_until_ready(
        forward_ref(params, inputs_1d, inputs_2d, mask, rot, trans))

    assert out_pallas.shape == (B, N_RES, NUM_CHANNEL)
    assert bool(jnp.all(jnp.isfinite(out_pallas)))
    # bf16 MXU operands vs a pure-f32 reference: use a bf16-appropriate
    # tolerance; outputs are O(1), so this still catches algorithmic mismatch.
    max_diff = float(jnp.max(jnp.abs(out_pallas - out_ref)))
    assert max_diff < 5e-2, f"Pallas kernel mismatch vs reference: {max_diff}"
    print("KERNEL_OK")
</pallas_src>

<mosaic_0001>
module attributes {stable_mosaic.version = 11 : i64} {
  func.func @_ipa_attention_kernel(%arg0: i32, %arg1: memref<1x4x8x22xbf16, #tpu.memory_space<vmem>>, %arg2: memref<1x4x8x22xbf16, #tpu.memory_space<vmem>>, %arg3: memref<1x4x8x20xbf16, #tpu.memory_space<vmem>>, %arg4: memref<1x4x8x8xf32, #tpu.memory_space<vmem>>, %arg5: memref<1x64x16xbf16, #tpu.memory_space<vmem>>, %arg6: memref<1x32x36xf32, #tpu.memory_space<vmem>>) attributes {dimension_semantics = [#tpu.dimension_semantics<parallel>], iteration_bounds = array<i64: 2>, scalar_prefetch = 0 : i64, scratch_operands = 0 : i64, tpu.core_type = #tpu.core_type<tc>, window_params = [{transform_indices = @transform_0, window_bounds = array<i64: 1, 4, 8, 22>}, {transform_indices = @transform_1, window_bounds = array<i64: 1, 4, 8, 22>}, {transform_indices = @transform_2, window_bounds = array<i64: 1, 4, 8, 20>}, {transform_indices = @transform_3, window_bounds = array<i64: 1, 4, 8, 8>}, {transform_indices = @transform_4, window_bounds = array<i64: 1, 64, 16>}, {transform_indices = @transform_5, window_bounds = array<i64: 1, 32, 36>}]} {
    %c0 = arith.constant 0 : index
    %c0_0 = arith.constant 0 : index
    %c0_1 = arith.constant 0 : index
    %c0_2 = arith.constant 0 : index
    %0 = vector.load %arg1[%c0, %c0_0, %c0_1, %c0_2] : memref<1x4x8x22xbf16, #tpu.memory_space<vmem>>, vector<1x4x8x22xbf16>
    %1 = vector.shape_cast %0 : vector<1x4x8x22xbf16> to vector<4x8x22xbf16>
    %c0_3 = arith.constant 0 : index
    %c0_4 = arith.constant 0 : index
    %c0_5 = arith.constant 0 : index
    %c0_6 = arith.constant 0 : index
    %2 = vector.load %arg2[%c0_3, %c0_4, %c0_5, %c0_6] : memref<1x4x8x22xbf16, #tpu.memory_space<vmem>>, vector<1x4x8x22xbf16>
    %3 = vector.shape_cast %2 : vector<1x4x8x22xbf16> to vector<4x8x22xbf16>
    %c0_7 = arith.constant 0 : index
    %c0_8 = arith.constant 0 : index
    %c0_9 = arith.constant 0 : index
    %c0_10 = arith.constant 0 : index
    %4 = vector.load %arg4[%c0_7, %c0_8, %c0_9, %c0_10] : memref<1x4x8x8xf32, #tpu.memory_space<vmem>>, vector<1x4x8x8xf32>
    %5 = vector.shape_cast %4 : vector<1x4x8x8xf32> to vector<4x8x8xf32>
    "tpu.trace_start"() <{level = 10 : i32, message = "hif,hjf->hij"}> : () -> ()
    %cst = arith.constant dense<0.000000e+00> : vector<4x8x8xf32>
    %6 = tpu.matmul %1, %3, %cst {dimension_numbers = #tpu.dot_dimension_numbers<[2], [2], [1], [1], [0, 0, 0, 1, 1, 1], [0], [0]>} : vector<4x8x22xbf16>, vector<4x8x22xbf16>, vector<4x8x8xf32> -> vector<4x8x8xf32>
    "tpu.trace_stop"() : () -> ()
    %7 = arith.addf %6, %5 : vector<4x8x8xf32>
    %cst_11 = arith.constant dense<0xFF800000> : vector<4x8xf32>
    %8 = vector.multi_reduction <maximumf>, %7, %cst_11 [2] : vector<4x8x8xf32> to vector<4x8xf32>
    %9 = vector.shape_cast %8 : vector<4x8xf32> to vector<4x8x1xf32>
    %10 = vector.broadcast %9 : vector<4x8x1xf32> to vector<4x8x8xf32>
    %11 = arith.subf %7, %10 : vector<4x8x8xf32>
    %12 = math.exp %11 : vector<4x8x8xf32>
    %cst_12 = arith.constant dense<0.000000e+00> : vector<4x8xf32>
    %13 = vector.multi_reduction <add>, %12, %cst_12 [2] : vector<4x8x8xf32> to vector<4x8xf32>
    %14 = vector.shape_cast %13 : vector<4x8xf32> to vector<4x8x1xf32>
    %15 = tpu.reciprocal %14 {approx = true} : vector<4x8x1xf32> -> vector<4x8x1xf32>
    %16 = vector.broadcast %15 : vector<4x8x1xf32> to vector<4x8x8xf32>
    %17 = arith.mulf %12, %16 : vector<4x8x8xf32>
    %18 = arith.truncf %17 : vector<4x8x8xf32> to vector<4x8x8xbf16>
    %c0_13 = arith.constant 0 : index
    %c0_14 = arith.constant 0 : index
    %c0_15 = arith.constant 0 : index
    %c0_16 = arith.constant 0 : index
    %19 = vector.load %arg3[%c0_13, %c0_14, %c0_15, %c0_16] : memref<1x4x8x20xbf16, #tpu.memory_space<vmem>>, vector<1x4x8x20xbf16>
    %20 = vector.shape_cast %19 : vector<1x4x8x20xbf16> to vector<4x8x20xbf16>
    "tpu.trace_start"() <{level = 10 : i32, message = "hij,hjf->hif"}> : () -> ()
    %cst_17 = arith.constant dense<0.000000e+00> : vector<4x8x20xf32>
    %21 = tpu.matmul %18, %20, %cst_17 {dimension_numbers = #tpu.dot_dimension_numbers<[2], [1], [1], [2], [0, 0, 0, 1, 1, 2], [0], [0]>} : vector<4x8x8xbf16>, vector<4x8x20xbf16>, vector<4x8x20xf32> -> vector<4x8x20xf32>
    "tpu.trace_stop"() : () -> ()
    %22 = vector.shape_cast %17 : vector<4x8x8xf32> to vector<32x8xf32>
    %23 = tpu.iota {dimensions = array<i32: 0>} : vector<32x64xi32>
    %24 = tpu.iota {dimensions = array<i32: 1>} : vector<32x64xi32>
    %c7_i32 = arith.constant 7 : i32
    %25 = vector.broadcast %c7_i32 : i32 to vector<32x64xi32>
    %26 = arith.andi %23, %25 : vector<32x64xi32>
    %c3_i32 = arith.constant 3 : i32
    %27 = vector.broadcast %c3_i32 : i32 to vector<32x64xi32>
    %28 = arith.shrsi %24, %27 : vector<32x64xi32>
    %29 = arith.cmpi eq, %26, %28 : vector<32x64xi32>
    %30 = tpu.concatenate %22, %22, %22, %22, %22, %22, %22, %22 in 1 : vector<32x8xf32>, vector<32x8xf32>, vector<32x8xf32>, vector<32x8xf32>, vector<32x8xf32>, vector<32x8xf32>, vector<32x8xf32>, vector<32x8xf32> -> vector<32x64xf32>
    %cst_18 = arith.constant 0.000000e+00 : f32
    %31 = vector.broadcast %cst_18 : f32 to vector<32x64xf32>
    %32 = arith.select %29, %30, %31 : vector<32x64xi1>, vector<32x64xf32>
    %33 = arith.truncf %32 : vector<32x64xf32> to vector<32x64xbf16>
    %c0_19 = arith.constant 0 : index
    %c0_20 = arith.constant 0 : index
    %c0_21 = arith.constant 0 : index
    %34 = vector.load %arg5[%c0_19, %c0_20, %c0_21] : memref<1x64x16xbf16, #tpu.memory_space<vmem>>, vector<1x64x16xbf16>
    %35 = vector.shape_cast %34 : vector<1x64x16xbf16> to vector<64x16xbf16>
    %cst_22 = arith.constant dense<0.000000e+00> : vector<32x16xf32>
    %36 = tpu.matmul %33, %35, %cst_22 {dimension_numbers = #tpu.dot_dimension_numbers<[1], [0], [0], [1], [0, 0, 1, 1], [], []>} : vector<32x64xbf16>, vector<64x16xbf16>, vector<32x16xf32> -> vector<32x16xf32>
    %37 = vector.shape_cast %21 : vector<4x8x20xf32> to vector<32x20xf32>
    %38 = tpu.concatenate %37, %36 in 1 : vector<32x20xf32>, vector<32x16xf32> -> vector<32x36xf32>
    %c0_23 = arith.constant 0 : index
    %c0_24 = arith.constant 0 : index
    %c0_25 = arith.constant 0 : index
    %39 = vector.load %arg6[%c0_23, %c0_24, %c0_25] : memref<1x32x36xf32, #tpu.memory_space<vmem>>, vector<1x32x36xf32>
    %40 = vector.shape_cast %39 : vector<1x32x36xf32> to vector<32x36xf32>
    %41 = vector.shape_cast %38 : vector<32x36xf32> to vector<1x32x36xf32>
    tpu.vector_store %arg6[%c0_23, %c0_24, %c0_25], %41 {strides = array<i32>} : memref<1x32x36xf32, #tpu.memory_space<vmem>>, vector<1x32x36xf32>,
    return
  }
  func.func @transform_0(%arg0: i32) -> (i32, i32, i32, i32) {
    %c0_i32 = arith.constant 0 : i32
    %c0_i32_0 = arith.constant 0 : i32
    %c0_i32_1 = arith.constant 0 : i32
    %c0_i32_2 = arith.constant 0 : i32
    return %arg0, %c0_i32, %c0_i32_0, %c0_i32_1 : i32, i32, i32, i32
  }
  func.func @transform_1(%arg0: i32) -> (i32, i32, i32, i32) {
    %c0_i32 = arith.constant 0 : i32
    %c0_i32_0 = arith.constant 0 : i32
    %c0_i32_1 = arith.constant 0 : i32
    %c0_i32_2 = arith.constant 0 : i32
    return %arg0, %c0_i32, %c0_i32_0, %c0_i32_1 : i32, i32, i32, i32
  }
  func.func @transform_2(%arg0: i32) -> (i32, i32, i32, i32) {
    %c0_i32 = arith.constant 0 : i32
    %c0_i32_0 = arith.constant 0 : i32
    %c0_i32_1 = arith.constant 0 : i32
    %c0_i32_2 = arith.constant 0 : i32
    return %arg0, %c0_i32, %c0_i32_0, %c0_i32_1 : i32, i32, i32, i32
  }
  func.func @transform_3(%arg0: i32) -> (i32, i32, i32, i32) {
    %c0_i32 = arith.constant 0 : i32
    %c0_i32_0 = arith.constant 0 : i32
    %c0_i32_1 = arith.constant 0 : i32
    %c0_i32_2 = arith.constant 0 : i32
    return %arg0, %c0_i32, %c0_i32_0, %c0_i32_1 : i32, i32, i32, i32
  }
  func.func @transform_4(%arg0: i32) -> (i32, i32, i32) {
    %c0_i32 = arith.constant 0 : i32
    %c0_i32_0 = arith.constant 0 : i32
    %c0_i32_1 = arith.constant 0 : i32
    return %arg0, %c0_i32, %c0_i32_0 : i32, i32, i32
  }
  func.func @transform_5(%arg0: i32) -> (i32, i32, i32) {
    %c0_i32 = arith.constant 0 : i32
    %c0_i32_0 = arith.constant 0 : i32
    %c0_i32_1 = arith.constant 0 : i32
    return %arg0, %c0_i32, %c0_i32_0 : i32, i32, i32
  }
}

</mosaic_0001>

<bundles_post_ra>
// kernel: ipa_forward.1
= control target key start
LH: loop header
LB: loop body
LE: loop exit
PB: predicated region body
PF: predicated region fallthrough
CT: control target
= control target key end

     0   :  { %s1379_s18 = smov 0   ;;  %s1542_s0 = inlined_call_operand.vmem [shape: bf16[2,4,8,22], index: 0, kind: input, shape index: {}]   ;;  %s1543_s1 = inlined_call_operand.vmem [shape: bf16[2,4,8,22], index: 1, kind: input, shape index: {}]   ;;  %s1544_s2 = inlined_call_operand.vmem [shape: bf16[2,4,8,20], index: 2, kind: input, shape index: {}]   ;;  %s1545_s3 = inlined_call_operand.vmem [shape: f32[2,4,8,8], index: 3, kind: input, shape index: {}]   ;;  %s1546_s4 = inlined_call_operand.vmem [shape: bf16[2,64,16], index: 4, kind: input, shape index: {}]   ;;  %s1547_s5 = inlined_call_operand.vmem [shape: f32[2,32,36], index: 5, kind: output, shape index: {}]  }
   0x1 LB: > { %s1102_s19 = sadd.s32 4294967295, %s1337_s18   ;;  %p1106_p0 = scmp.ge.s32.totalorder %s1337_s18, 1  ;;  %s1337_s18 = sphi %s1379_s18, %s15_s18  }
   0x2   : > { %p227_p1 = scmp.lt.s32.totalorder %s1337_s18, 3 }
   0x4   : > { %p228_p2 = pnand %p1106_p0, %p227_p1 }
   0x5   : > { %p275_p3 = scmp.lt.s32.totalorder (!%p228_p2), %s1102_s19, 1  ;;  %s1341_s12 = smov (!%p228_p2), 16  }
   0x6   : > { %231 = sbr.rel (%p228_p2) target bundleno = 1013 (0x3f5), region = 40  ;;  %s1342_s13 = smov (!%p228_p2), 8  }
   0x7   : > { %s1343_s14 = smov (!%p228_p2), 24   ;;  %s1344_s15 = smov (!%p228_p2), 32  }
   0x8   : > { %s1345_s16 = smov (!%p228_p2), 40   ;;  %s1346_s17 = smov (!%p228_p2), 48  }
   0xb   : > { %v1339_v0 = vmov 0.0   ;;  %s1553_s19 = smov (!%p275_p3, %s1102_s19), 1  ;;  %vm1340_vm0 = vmmov 0   ;;  %vm318_vm1 = vcmask 179200   ;;  %vm503_vm2 = vcmask 64512  }
   0xc   : > { %1163 = vmatprep.subr.bf16.mxu1 %v1339_v0  ;;  %1175 = vmatprep.subr.bf16.mxu0 %v1339_v0  ;;  %s1393_s20 = sshll.u32 %s1553_s19, 4  ;;  %s1401_s24 = sshll.u32 %s1553_s19, 5  ;;  %vm559_vm3 = vcmask 1043456   ;;  %vm849_vm4 = vcmask 130048   ;;  %vm854_vm5 = vcmask 195584   ;;  %vm859_vm6 = vcmask 261120  }
   0xd   : > { %1165 = vmatprep.mubr.msk.bf16.mxu1 %vm1340_vm0, %v1339_v0  ;;  %1177 = vmatprep.mubr.msk.bf16.mxu0 %vm1340_vm0, %v1339_v0  ;;  %s284_s23 = scalar_lea.vmem %s1543_s1, %s1393_s20  ;;  %s1407_s27 = scalar_lea.vmem %s1546_s4, %s1401_s24  ;;  %vm864_vm7 = vcmask 326656   ;;  %vm869_vm8 = vcmask 392192   ;;  %vm874_vm9 = vcmask 457728   ;;  %vm917_vm12 = vcmask 523264  }
   0xe   : > { %v310_v1 = vld [vmem:[%s284_s23] sm:$0xf]  ;;  %v312_v2 = vld [vmem:[%s284_s23 + $0x8] sm:$0xf]  ;;  %s279_s30 = scalar_lea.vmem %s1542_s0, %s1393_s20  ;;  %v311_v5 = vld [vmem:[%s284_s23 + $0x4] sm:$0xf]  ;;  %s294_s8 = scalar_lea.vmem %s1545_s3, %s1401_s24 }
   0xf   : > { %v323_v3 = vsel %vm318_vm1, %v310_v1, 0  ;;  %v415_v4 = vsel %vm318_vm1, %v312_v2, 0  ;;  %v306_v6 = vld [vmem:[%s279_s30] sm:$0xf]  ;;  %v308_v7 = vld [vmem:[%s279_s30 + $0x8] sm:$0xf]  ;;  %s289_s11 = scalar_lea.vmem %s1544_s2, %s1393_s20 }
  0x10   : > { %1164 = vmatpush3.bf16.xpose.msra.mxu1 %v323_v3  ;;  %1176 = vmatpush3.bf16.xpose.msra.mxu0 %v415_v4  ;;  %v369_v8 = vsel %vm318_vm1, %v311_v5, 0  ;;  %v313_v9 = vld [vmem:[%s284_s23 + $0xc] sm:$0xf]  ;;  %v307_v10 = vld [vmem:[%s279_s30 + $0x4] sm:$0xf]  ;;  %v316_v14 = vld [vmem:[%s294_s8 + $0x10] sm:$0xff]  ;;  %s304_s23 = scalar_lea.vmem %s1547_s5, %s1401_s24 }
  0x11   : > { %1169 = vmatprep.subr.bf16.mxu1 %v1339_v0  ;;  %1187 = vmatprep.subr.bf16.mxu0 %v1339_v0  ;;  %v461_v11 = vsel %vm318_vm1, %v313_v9, 0  ;;  %v309_v12 = vld [vmem:[%s279_s30 + $0xc] sm:$0xf]  ;;  %v314_v13 = vld [vmem:[%s294_s8] sm:$0xff]  ;;  %v317_v34 = vld [vmem:[%s294_s8 + $0x18] sm:$0xff]  ;;  %s1347_s19 = smov 56  }
  0x12   : > { %v315_v26 = vld [vmem:[%s294_s8 + $0x8] sm:$0xff]  ;;  %v552_v61 = vld [vmem:[%s289_s11] sm:$0xf]  ;;  %v553_v63 = vld [vmem:[%s289_s11 + $0x4] sm:$0xf]  ;;  %s1348_s20 = smov 20  }
  0x13   : > { %v561_v62 = vsel %vm559_vm3, %v552_v61, 0  ;;  %v554_v1 = vld [vmem:[%s289_s11 + $0x8] sm:$0xf]  ;;  %v607_v2 = vsel %vm559_vm3, %v553_v63, 0  ;;  %v555_v4 = vld [vmem:[%s289_s11 + $0xc] sm:$0xf] }
  0x14   : > { %v653_v3 = vsel %vm559_vm3, %v554_v1, 0  ;;  %v699_v5 = vsel %vm559_vm3, %v555_v4, 0  ;;  %vm989_vm15 = vcmask 162816  }
  0x17   : > { %1166 = vmatmul.mubr.msk.bf16.vlgmr.msra.gmra.mxu1 %vm318_vm1, %v306_v6  ;;  %1178 = vmatmul.mubr.msk.bf16.vlgmr.msra.gmra.mxu0 %vm318_vm1, %v308_v7 }
  0x18   : > { %1170 = vmatpush3.bf16.xpose.msra.mxu1 %v369_v8  ;;  %1171 = vmatprep.mubr.msk.bf16.mxu1 %vm1340_vm0, %v1339_v0 }
  0x19   : > { %1181 = vmatprep.subr.bf16.mxu1 %v1339_v0  ;;  %1189 = vmatprep.mubr.msk.bf16.mxu0 %vm1340_vm0, %v1339_v0 }
  0x1a   : > { %1188 = vmatpush3.bf16.msra.mxu0 %v561_v62 }
  0x1b   : > { %1199 = vmatprep.subr.bf16.mxu0 %v1339_v0 }
  0x1f   : > { %1172 = vmatmul.mubr.msk.bf16.vlgmr.msra.gmra.mxu1 %vm318_vm1, %v307_v10 }
  0x20   : > { %1182 = vmatpush3.bf16.xpose.msra.mxu1 %v461_v11  ;;  %1183 = vmatprep.mubr.msk.bf16.mxu1 %vm1340_vm0, %v1339_v0 }
  0x21   : > { %1193 = vmatprep.subr.bf16.mxu1 %v1339_v0 }
  0x27   : > { %1184 = vmatmul.mubr.msk.bf16.vlgmr.msra.gmra.mxu1 %vm318_vm1, %v309_v12 }
  0x28   : > { %1195 = vmatprep.mubr.msk.bf16.mxu1 %vm1340_vm0, %v1339_v0  ;;  %1194 = vmatpush3.bf16.msra.mxu1 %v607_v2 }
  0x29   : > { %1205 = vmatprep.subr.bf16.mxu1 %v1339_v0 }
  0xd7   : > { %v359_v15 = vpop.f32.mrf.mxu1  ;;  %v451_v16 = vpop.f32.mrf.mxu0 }
  0xd8   : > { %v360_v17 = vadd.f32 %v359_v15, %v314_v13  ;;  %v452_v18 = vadd.f32 %v451_v16, %v316_v14 }
  0xd9   : > { %v1167_v19 = vpop.f32.mrf.mxu1  ;;  %v1179_v20 = vpop.f32.mrf.mxu0 }
  0xda   : > { %v510_v21 = vsel %vm503_vm2, %v452_v18, -inf  ;;  %v504_v22 = vsel %vm503_vm2, %v360_v17, -inf }
  0xdb   : > { %511 = vmax.xlane.f32.xlu1 %v510_v21  ;;  %505 = vmax.xlane.f32.xlu0 %v504_v22  ;;  %v362_v23 = vpop.f32.mrf.mxu1  ;;  %v454_v24 = vpop.f32.mrf.mxu0 }
  0xdc   : > { %v1311_v24 = vld [vmem:[%s1407_s27 + $0x18] sm:$0xff]  }
  0xdd   : > { %v1168_v25 = vpop.f32.mrf.mxu1  ;;  %v1180_v27 = vpop.f32.mrf.mxu0 }
  0xde   : > { %v1313_v25 = vld [vmem:[%s1407_s27 + $0x8] sm:$0xff]  }
  0xdf   : > { %v405_v28 = vpop.f32.mrf.mxu1 }
  0xe0   : > { %v406_v29 = vadd.f32 %v405_v28, %v315_v26  ;;  %v1314_v26 = vld [vmem:[%s1407_s27] sm:$0xff]  }
  0xe1   : > { %v1173_v30 = vpop.f32.mrf.mxu1 }
  0xe2   : > { %v507_v31 = vsel %vm503_vm2, %v406_v29, -inf  ;;  %v741_v30 = vlaneseq }
  0xe3   : > { %508 = vmax.xlane.f32.xlu0 %v507_v31  ;;  %v408_v32 = vpop.f32.mrf.mxu1 }
  0xe5   : > { %v1174_v33 = vpop.f32.mrf.mxu1 }
  0xe6   : > { %v742_v33 = vshrl.u32 %v741_v30, 7 }
  0xe7   : > { %v497_v35 = vpop.f32.mrf.mxu1 }
  0xe8   : > { %v498_v36 = vadd.f32 %v497_v35, %v317_v34 }
  0xe9   : > { %v1185_v37 = vpop.f32.mrf.mxu1 }
  0xea   : > { %v513_v38 = vsel %vm503_vm2, %v498_v36, -inf }
  0xeb   : > { %514 = vmax.xlane.f32.xlu1 %v513_v38  ;;  %v500_v39 = vpop.f32.mrf.mxu1  ;;  %v743_v38 = vadd.s32 8, %v742_v33 }
  0xec   : > { %v747_v39 = vand.u32 127, %v741_v30 }
  0xed   : > { %v1186_v40 = vpop.f32.mrf.mxu1 }
 0x164   : > { %v512_v41 = vpop.xlane.xlu1 %511  ;;  %v506_v42 = vpop.xlane.xlu0 %505 }
 0x165   : > { %v518_v43 = vsub.f32 %v452_v18, %v512_v41  ;;  %v516_v44 = vsub.f32 %v360_v17, %v506_v42  ;;  %v748_v42 = vand.u32 7, %v742_v33 }
 0x167   : > { %v520_v45 = vmul.f32 1.442695, %v516_v44  ;;  %v524_v46 = vmul.f32 1.442695, %v518_v43 }
 0x169   : > { %1315 = vpow2.f32 %v520_v45 }
 0x16a   : > { %1317 = vpow2.f32 %v524_v46 }
 0x16c   : > { %v509_v47 = vpop.xlane.xlu0 %508 }
 0x16d   : > { %v517_v48 = vsub.f32 %v406_v29, %v509_v47 }
 0x16f   : > { %v522_v49 = vmul.f32 1.442695, %v517_v48 }
 0x171   : > { %1319 = vpow2.f32 %v522_v49 }
 0x174   : > { %v515_v50 = vpop.xlane.xlu1 %514 }
 0x175   : > { %v519_v51 = vsub.f32 %v498_v36, %v515_v50 }
 0x176   : > { %v1316_v52 = vpop.eup %1315 }
 0x177   : > { %v526_v53 = vmul.f32 1.442695, %v519_v51  ;;  %v528_v54 = vsel %vm503_vm2, %v1316_v52, 0.0  ;;  %v1318_v55 = vpop.eup %1317  ;;  %v749_v51 = vand.u32 7, %v743_v38 }
 0x178   : > { %529 = vadd.xlane.f32.xlu0 %v528_v54  ;;  %v534_v56 = vsel %vm503_vm2, %v1318_v55, 0.0 }
 0x179   : > { %1321 = vpow2.f32 %v526_v53 }
 0x17c   : > { %535 = vadd.xlane.f32.xlu0 %v534_v56 }
 0x17e   : > { %v1320_v57 = vpop.eup %1319 }
 0x17f   : > { %v531_v58 = vsel %vm503_vm2, %v1320_v57, 0.0 }
 0x180   : > { %532 = vadd.xlane.f32.xlu1 %v531_v58 }
 0x186   : > { %v1322_v59 = vpop.eup %1321 }
 0x187   : > { %v537_v60 = vsel %vm503_vm2, %v1322_v59, 0.0 }
 0x188   : > { %538 = vadd.xlane.f32.xlu1 %v537_v60 }
 0x201   : > { %v530_v6 = vpop.xlane.xlu0 %529 }
 0x202   : > { %1323 = vrcp.f32 %v530_v6 }
 0x205   : > { %v536_v7 = vpop.xlane.xlu0 %535 }
 0x206   : > { %1325 = vrcp.f32 %v536_v7 }
 0x209   : > { %v533_v8 = vpop.xlane.xlu1 %532 }
 0x20a   : > { %1327 = vrcp.f32 %v533_v8 }
 0x20f   : > { %v1324_v9 = vpop.eup %1323 }
 0x210   : > { %v1449_v10 = vmul.f32 %v1324_v9, %v1316_v52  ;;  %v752_v52 = vshra.s32 %v747_v39, 3 }
 0x211   : > { %v539_v11 = vpop.xlane.xlu1 %538 }
 0x212   : > { %1329 = vrcp.f32 %v539_v11  ;;  %v548_v12 = vpack.c.bf16 %v1449_v10, %v1449_v10  ;;  %vm1495_vm10 = vcmp.eq.s32.totalorder %v748_v42, %v752_v52  ;;  %vm1499_vm11 = vcmp.eq.s32.totalorder %v749_v51, %v752_v52 }
 0x213   : > { %v1326_v13 = vpop.eup %1325 }
 0x214   : > { %1190 = vmatmul.mubr.msk.bf16.vlgmr.msra.gmra.mxu0 %vm503_vm2, %v548_v12  ;;  %v1456_v15 = vmul.f32 %v1326_v13, %v1318_v55 }
 0x215   : > { %1200 = vmatpush3.bf16.msra.mxu0 %v653_v3  ;;  %1201 = vmatprep.mubr.msk.bf16.mxu0 %vm1340_vm0, %v1339_v0 }
 0x216   : > { %v550_v19 = vpack.c.bf16 %v1456_v15, %v1456_v15  ;;  %1211 = vmatprep.subr.bf16.mxu0 %v1311_v24 }
 0x217   : > { %v1328_v14 = vpop.eup %1327 }
 0x218   : > { %v1458_v16 = vmul.f32 %v1328_v14, %v1320_v57 }
 0x21a   : > { %v1246_v17 = vpack.i.bf16 %v1458_v16, %v1449_v10  ;;  %v549_v18 = vpack.c.bf16 %v1458_v16, %v1458_v16 }
 0x21c   : > { %1247 = vrot.lane.b32.xlu1 %v1246_v17, %s1341_s12  ;;  %1242 = vrot.lane.b32.xlu0 %v1246_v17, %s1342_s13 }
 0x21d   : > { %1202 = vmatmul.mubr.msk.bf16.vlgmr.msra.gmra.mxu0 %vm503_vm2, %v550_v19  ;;  %1196 = vmatmul.mubr.msk.bf16.vlgmr.msra.gmra.mxu1 %vm503_vm2, %v549_v18 }
 0x21e   : > { %1206 = vmatpush3.bf16.msra.mxu1 %v699_v5  ;;  %1207 = vmatprep.mubr.msk.bf16.mxu1 %vm1340_vm0, %v1339_v0  ;;  %v1312_v0 = vld [vmem:[%s1407_s27 + $0x10] sm:$0xff]   ;;  %vm994_vm0 = vcmask 293888  }
 0x21f   : > { %v1330_v20 = vpop.eup %1329  ;;  %1212 = vmatpush3.bf16.msra.mxu0 %v1311_v24 }
 0x220   : > { %v1470_v21 = vmul.f32 %v1330_v20, %v1322_v59  ;;  %1252 = vrot.lane.b32.xlu0 %v1246_v17, %s1343_s14  ;;  %1213 = vmatprep.subr.bf16.mxu0 %v1312_v0 }
 0x222   : > { %v1276_v22 = vpack.i.bf16 %v1470_v21, %v1456_v15  ;;  %v551_v23 = vpack.c.bf16 %v1470_v21, %v1470_v21 }
 0x223   : > { %1214 = vmatpush3.bf16.msra.mxu0 %v1312_v0 }
 0x224   : > { %1257 = vrot.lane.b32.xlu0 %v1246_v17, %s1344_s15  ;;  %1277 = vrot.lane.b32.xlu1 %v1276_v22, %s1342_s13 }
 0x225   : > { %1208 = vmatmul.mubr.msk.bf16.vlgmr.msra.gmra.mxu1 %vm503_vm2, %v551_v23  ;;  %1215 = vmatprep.subr.bf16.mxu0 %v1313_v25 }
 0x227   : > { %1216 = vmatpush3.bf16.msra.mxu0 %v1313_v25 }
 0x228   : > { %1262 = vrot.lane.b32.xlu0 %v1246_v17, %s1345_s16  ;;  %1282 = vrot.lane.b32.xlu1 %v1276_v22, %s1341_s12 }
 0x229   : > { %1217 = vmatprep.subr.bf16.mxu0 %v1314_v26 }
 0x22b   : > { %1218 = vmatpush3.bf16.msra.mxu0 %v1314_v26 }
 0x22c   : > { %1267 = vrot.lane.b32.xlu0 %v1246_v17, %s1346_s17  ;;  %1287 = vrot.lane.b32.xlu1 %v1276_v22, %s1343_s14 }
 0x230   : > { %1272 = vrot.lane.b32.xlu0 %v1246_v17, %s1347_s19  ;;  %1292 = vrot.lane.b32.xlu1 %v1276_v22, %s1344_s15  ;;  %v745_v17 = vadd.s32 24, %v742_v33 }
 0x234   : > { %1297 = vrot.lane.b32.xlu1 %v1276_v22, %s1345_s16 }
 0x238   : > { %1302 = vrot.lane.b32.xlu1 %v1276_v22, %s1346_s17 }
 0x23c   : > { %1307 = vrot.lane.b32.xlu1 %v1276_v22, %s1347_s19 }
 0x28e   : > { %v1243_v27 = vpop.permute.xlu0 %1242  ;;  %v1248_v28 = vpop.permute.xlu1 %1247 }
 0x28f   : > { %v1245_v34 = vunpack.i.h.bf16 %v1243_v27  ;;  %v1244_v35 = vunpack.i.l.bf16 %v1243_v27  ;;  %v1250_v40 = vunpack.i.h.bf16 %v1248_v28  ;;  %v1249_v41 = vunpack.i.l.bf16 %v1248_v28 }
 0x291   : > { %v846_v43 = vsel %vm503_vm2, %v1458_v16, %v1245_v34  ;;  %v845_v44 = vsel %vm503_vm2, %v1449_v10, %v1244_v35  ;;  %v744_v16 = vadd.s32 16, %v742_v33 }
 0x292   : > { %v1253_v29 = vpop.permute.xlu0 %1252  ;;  %v851_v55 = vsel %vm849_vm4, %v846_v43, %v1250_v40  ;;  %v850_v56 = vsel %vm849_vm4, %v845_v44, %v1249_v41 }
 0x293   : > { %v1255_v45 = vunpack.i.h.bf16 %v1253_v29  ;;  %v1254_v46 = vunpack.i.l.bf16 %v1253_v29  ;;  %v750_v28 = vand.u32 7, %v744_v16  ;;  %v751_v29 = vand.u32 7, %v745_v17 }
 0x295   : > { %v855_v59 = vsel %vm854_vm5, %v850_v56, %v1254_v46  ;;  %v856_v60 = vsel %vm854_vm5, %v851_v55, %v1255_v45  ;;  %vm755_vm13 = vcmp.eq.s32.totalorder %v750_v28, %v752_v52  ;;  %vm756_vm14 = vcmp.eq.s32.totalorder %v751_v29, %v752_v52 }
 0x296   : > { %v1258_v31 = vpop.permute.xlu0 %1257  ;;  %v1481_v32 = vpop.permute.xlu1 %1277 }
 0x297   : > { %v1260_v47 = vunpack.i.h.bf16 %v1258_v31  ;;  %v1259_v48 = vunpack.i.l.bf16 %v1258_v31  ;;  %v1280_v18 = vunpack.i.h.bf16 %v1481_v32  ;;  %v1279_v19 = vunpack.i.l.bf16 %v1481_v32 }
 0x299   : > { %v860_v61 = vsel %vm859_vm6, %v855_v59, %v1259_v48  ;;  %v861_v62 = vsel %vm859_vm6, %v856_v60, %v1260_v47  ;;  %v848_v30 = vsel %vm503_vm2, %v1470_v21, %v1280_v18  ;;  %v847_v31 = vsel %vm503_vm2, %v1456_v15, %v1279_v19 }
 0x29a   : > { %v1263_v36 = vpop.permute.xlu0 %1262  ;;  %v1483_v37 = vpop.permute.xlu1 %1282 }
 0x29b   : > { %v1265_v53 = vunpack.i.h.bf16 %v1263_v36  ;;  %v1264_v54 = vunpack.i.l.bf16 %v1263_v36  ;;  %v1285_v22 = vunpack.i.h.bf16 %v1483_v37  ;;  %v1284_v23 = vunpack.i.l.bf16 %v1483_v37 }
 0x29d   : > { %v865_v4 = vsel %vm864_vm7, %v860_v61, %v1264_v54  ;;  %v866_v5 = vsel %vm864_vm7, %v861_v62, %v1265_v53  ;;  %v852_v34 = vsel %vm849_vm4, %v847_v31, %v1284_v23  ;;  %v853_v35 = vsel %vm849_vm4, %v848_v30, %v1285_v22 }
 0x29e   : > { %v1268_v49 = vpop.permute.xlu0 %1267  ;;  %v1288_v50 = vpop.permute.xlu1 %1287 }
 0x29f   : > { %v1270_v57 = vunpack.i.h.bf16 %v1268_v49  ;;  %v1269_v58 = vunpack.i.l.bf16 %v1268_v49  ;;  %v1290_v24 = vunpack.i.h.bf16 %v1288_v50  ;;  %v1289_v0 = vunpack.i.l.bf16 %v1288_v50 }
 0x2a1   : > { %v870_v8 = vsel %vm869_vm8, %v865_v4, %v1269_v58  ;;  %v871_v9 = vsel %vm869_vm8, %v866_v5, %v1270_v57  ;;  %v857_v38 = vsel %vm854_vm5, %v852_v34, %v1289_v0  ;;  %v858_v39 = vsel %vm854_vm5, %v853_v35, %v1290_v24 }
 0x2a2   : > { %v1273_v2 = vpop.permute.xlu0 %1272  ;;  %v1293_v3 = vpop.permute.xlu1 %1292 }
 0x2a3   : > { %v1275_v6 = vunpack.i.h.bf16 %v1273_v2  ;;  %v1274_v7 = vunpack.i.l.bf16 %v1273_v2  ;;  %v1295_v25 = vunpack.i.h.bf16 %v1293_v3  ;;  %v1294_v26 = vunpack.i.l.bf16 %v1293_v3 }
 0x2a5   : > { %v875_v10 = vsel %vm874_vm9, %v870_v8, %v1274_v7  ;;  %v876_v11 = vsel %vm874_vm9, %v871_v9, %v1275_v6  ;;  %v862_v40 = vsel %vm859_vm6, %v857_v38, %v1294_v26  ;;  %v863_v41 = vsel %vm859_vm6, %v858_v39, %v1295_v25 }
 0x2a6   : > { %v879_v12 = vsel %vm1495_vm10, %v875_v10, 0.0  ;;  %v880_v13 = vsel %vm1499_vm11, %v876_v11, 0.0  ;;  %v1298_v14 = vpop.permute.xlu1 %1297 }
 0x2a7   : > { %v883_v20 = vpack.c.bf16 %v880_v13, %v879_v12  ;;  %v1300_v32 = vunpack.i.h.bf16 %v1298_v14  ;;  %v1299_v33 = vunpack.i.l.bf16 %v1298_v14 }
 0x2a9   : > { %1219 = vmatprep.mubr.msk.bf16.mxu0 %vm917_vm12, %v883_v20  ;;  %v867_v15 = vsel %vm864_vm7, %v862_v40, %v1299_v33  ;;  %v868_v42 = vsel %vm864_vm7, %v863_v41, %v1300_v32 }
 0x2aa   : > { %v1303_v27 = vpop.permute.xlu1 %1302 }
 0x2ab   : > { %v1305_v36 = vunpack.i.h.bf16 %v1303_v27  ;;  %v1304_v37 = vunpack.i.l.bf16 %v1303_v27 }
 0x2ad   : > { %v872_v45 = vsel %vm869_vm8, %v867_v15, %v1304_v37  ;;  %v873_v46 = vsel %vm869_vm8, %v868_v42, %v1305_v36 }
 0x2ae   : > { %v1308_v21 = vpop.permute.xlu1 %1307 }
 0x2af   : > { %v1310_v43 = vunpack.i.h.bf16 %v1308_v21  ;;  %v1309_v44 = vunpack.i.l.bf16 %v1308_v21 }
 0x2b1   : > { %v877_v47 = vsel %vm874_vm9, %v872_v45, %v1309_v44  ;;  %v878_v48 = vsel %vm874_vm9, %v873_v46, %v1310_v43 }
 0x2b2   : > { %v881_v49 = vsel %vm755_vm13, %v877_v47, 0.0  ;;  %v882_v50 = vsel %vm756_vm14, %v878_v48, 0.0 }
 0x2b3   : > { %v884_v51 = vpack.c.bf16 %v882_v50, %v881_v49 }
 0x2b5   : > { %1220 = vmatmul.mubr.msk.bf16.vlgmr.msra.gmra.mxu0 %vm917_vm12, %v884_v51 }
 0x2d4   : > { %v597_v52 = vpop.f32.mrf.mxu0 }
 0x2d6   : > { %v1191_v53 = vpop.f32.mrf.mxu0 }
 0x2d8   : > { %v600_v54 = vpop.f32.mrf.mxu0 }
 0x2da   : > { %v1192_v55 = vpop.f32.mrf.mxu0 }
 0x2dd   : > { %v643_v56 = vpop.f32.mrf.mxu1  ;;  %v689_v57 = vpop.f32.mrf.mxu0 }
 0x2df   : > { %v1197_v58 = vpop.f32.mrf.mxu1  ;;  %v1203_v59 = vpop.f32.mrf.mxu0 }
 0x2e1   : > { %v646_v60 = vpop.f32.mrf.mxu1  ;;  %v692_v61 = vpop.f32.mrf.mxu0 }
 0x2e3   : > { %v1198_v62 = vpop.f32.mrf.mxu1  ;;  %v1204_v63 = vpop.f32.mrf.mxu0 }
 0x2e5   : > { %v735_v1 = vpop.f32.mrf.mxu1 }
 0x2e7   : > { %v1209_v2 = vpop.f32.mrf.mxu1 }
 0x2e9   : > { %v738_v3 = vpop.f32.mrf.mxu1 }
 0x2eb   : > { %v1210_v4 = vpop.f32.mrf.mxu1 }
 0x375   : > { %v1221_v5 = vpop.f32.mrf.mxu0 }
 0x377   : > { %v958_v6 = vpop.f32.mrf.mxu0 }
 0x378   : > { %977 = vrot.lane.b32.xlu0 %v958_v6, %s1348_s20 }
 0x379   : > { %v1222_v7 = vpop.f32.mrf.mxu0 }
 0x37b   : > { %v961_v8 = vpop.f32.mrf.mxu0 }
 0x37c   : > { %981 = vrot.lane.b32.xlu0 %v1221_v5, %s1348_s20  ;;  %979 = vrot.lane.b32.xlu1 %v961_v8, %s1348_s20 }
 0x380   : > { %983 = vrot.lane.b32.xlu1 %v1222_v7, %s1348_s20 }
 0x3ea   : > { %v978_v9 = vpop.permute.xlu0 %977 }
 0x3eb   : > { %v990_v10 = vsel %vm989_vm15, %v597_v52, %v978_v9 }
 0x3ec   : > { %995 = vst.msk [vmem:[%s304_s23] sm:$0xff] %vm994_vm0, %v990_v10 }
 0x3ee   : > { %v982_v11 = vpop.permute.xlu0 %981  ;;  %v980_v12 = vpop.permute.xlu1 %979 }
 0x3ef   : > { %v992_v13 = vsel %vm989_vm15, %v689_v57, %v982_v11  ;;  %v991_v14 = vsel %vm989_vm15, %v643_v56, %v980_v12 }
 0x3f0   : > { %997 = vst.msk [vmem:[%s304_s23 + $0x10] sm:$0xff] %vm994_vm0, %v992_v13  ;;  %996 = vst.msk [vmem:[%s304_s23 + $0x8] sm:$0xff] %vm994_vm0, %v991_v14 }
 0x3f2   : > { %v984_v16 = vpop.permute.xlu1 %983 }
 0x3f3   : > { %v993_v17 = vsel %vm989_vm15, %v735_v1, %v984_v16 }
 0x3f4   : > { %998 = vst.msk [vmem:[%s304_s23 + $0x18] sm:$0xff] %vm994_vm0, %v993_v17 }
 0x3f5 PF: > { %s15_s18 = sadd.s32 1, %s1337_s18  }
 0x3f6   : > { %p12_p4 = scmp.ge.s32.totalorder %s15_s18, 4  }
 0x3f8   :  { %14 = sbr.rel (!%p12_p4) target bundleno = 1 (0x1), region = 82 }

</bundles_post_ra>
